<compile_context>
chip_gen: v5e
topology: v5e:2x2
jax: 0.10.0
libtpu: 0.0.40
codegen_flags: <defaults>
</compile_context>

<pallas_src>
import queue
from functools import partial
from typing import Any, Dict, Set

import numpy as np

import jax
import jax.numpy as jnp
from jax.experimental import pallas as pl
from jax.experimental.pallas import tpu as pltpu

_LANE = 128
_MIN_DEVICE_PASS_BYTES = 1 << 20  # < 1 MiB: launch overhead dominates, skip.


# ----------------------------------------------------------------------------
# Pallas kernel: device pass-through (identity copy of one tile).
# ----------------------------------------------------------------------------
def _copy_kernel(x_ref, o_ref):
    o_ref[...] = x_ref[...]


def _sublane_multiple(dtype) -> int:
    itemsize = jnp.dtype(dtype).itemsize
    return {4: 8, 2: 16, 1: 32}.get(itemsize, 8)


def _vmem_capacity_bytes() -> int:
    """Physical VMEM per TensorCore; conservative default if query fails."""
    try:
        return int(pltpu.get_tpu_info().vmem_capacity_bytes)
    except Exception:
        return 64 * 1024 * 1024  # v7x floor — safe on every generation


def _identity_device_pass(x: jnp.ndarray) -> jnp.ndarray:
    """One tiled, aliased Pallas pass-through of x (only for multi-MiB x)."""
    orig_shape = x.shape
    dtype = x.dtype
    itemsize = jnp.dtype(dtype).itemsize
    n = x.size
    nbytes = n * itemsize

    if n == 0:
        return x

    if n % _LANE == 0:
        # Lane-dense 2D slab (pure reshape, no padding, unmasked vst).
        rows, lane = n // _LANE, _LANE
        x2d = x.reshape(rows, lane)
    else:
        # Ragged fallback: keep last dim at full extent, tile the rows.
        x2d = x.reshape(-1, orig_shape[-1]) if x.ndim >= 2 else x.reshape(1, n)
        rows, lane = x2d.shape

    sub = _sublane_multiple(dtype)

    # Generation-aware block cap: 2 ops * 2 bufs * block must fit comfortably
    # in scoped VMEM.  ~6 MiB blocks on v7x (64 MiB), ~12 MiB on v5e/v6e.
    vmem_cap = _vmem_capacity_bytes()
    block_cap_bytes = max(sub * lane * itemsize, (vmem_cap * 3) // 32)

    row_bytes = lane * itemsize
    max_tile_from_vmem = max(sub, (block_cap_bytes // row_bytes) // sub * sub)

    if rows >= 2 * sub:
        # Cap at ~half the rows (sublane-multiple) so the grid always has at
        # least 2 steps and v7x megacore can shard the "parallel" axis.
        half_rows = max(sub, (rows // 2) // sub * sub)
        tile_r = min(max_tile_from_vmem, half_rows)
    else:
        # Tiny tensor: a single full-extent block always lowers.
        tile_r = rows

    grid = (pl.cdiv(rows, tile_r),)

    # Explicit scoped-VMEM budget (v5e defaults to only 16 MiB scoped).
    block_bytes = tile_r * lane * itemsize
    vmem_limit = int(min(vmem_cap * 3 // 4, max(32 << 20, 4 * block_bytes + (4 << 20))))

    out2d = pl.pallas_call(
        _copy_kernel,
        out_shape=jax.ShapeDtypeStruct((rows, lane), dtype),
        grid=grid,
        in_specs=[pl.BlockSpec((tile_r, lane), lambda i: (i, 0))],
        out_specs=pl.BlockSpec((tile_r, lane), lambda i: (i, 0)),
        input_output_aliases={0: 0},
        compiler_params=pltpu.CompilerParams(
            dimension_semantics=("parallel",),
            vmem_limit_bytes=vmem_limit,
        ),
        cost_estimate=pl.CostEstimate(
            flops=0, transcendentals=0, bytes_accessed=2 * nbytes
        ),
    )(x2d)

    return out2d.reshape(orig_shape)


@partial(jax.jit, static_argnames=("force",), donate_argnums=(0,))
def _identity_pass_jit(x: jnp.ndarray, force: bool = False) -> jnp.ndarray:
    """Donated entry point.  Skips the launch for sub-MiB tensors unless forced."""
    nbytes = x.size * jnp.dtype(x.dtype).itemsize
    if (not force) and nbytes < _MIN_DEVICE_PASS_BYTES:
        return x
    return _identity_device_pass(x)


# ----------------------------------------------------------------------------
# JAX-side reimplementation of the agent orchestration.  The original module
# has no learnable tensors and no tensor ops; agents are pure Python control
# flow.  The forward is an identity map on x.
# ----------------------------------------------------------------------------
class AgentModuleJax:
    """Base agent: drains its task queue; every task application is identity."""

    def __init__(self):
        self.agent_state: Dict[str, Any] = {}
        self.task_queue: "queue.Queue" = queue.Queue()
        self.message_queue: "queue.Queue" = queue.Queue()
        self.agent_parameters: Dict[str, Any] = {}
        self.reward_history = []
        self.is_expert = False
        self.expertise_areas: Set[str] = set()

    def register_agent(self, name: str, parameters: Dict[str, Any]) -> None:
        self.agent_parameters[name] = parameters

    def assign_task(self, task: Dict[str, Any]) -> None:
        self.task_queue.put(task)

    def send_message(self, target_agent: str, message: Dict[str, Any]) -> None:
        self.message_queue.put((target_agent, message))

    def receive_reward(self, reward: float) -> None:
        self.reward_history.append(reward)

    def specialize(self, area: str) -> None:
        self.expertise_areas.add(area)
        self.is_expert = True

    def __call__(self, x: jnp.ndarray) -> jnp.ndarray:
        while not self.task_queue.empty():
            task = self.task_queue.get()
            if self.is_expert and any(area in task for area in self.expertise_areas):
                x = self._expert_forward(x, task)
            else:
                x = self._standard_forward(x, task)
        return x

    # Identical to the PyTorch module: return x unchanged.
    def _expert_forward(self, x, task):
        return x

    def _standard_forward(self, x, task):
        return x


class AgentNetworkJax(AgentModuleJax):
    """Network of cooperating agents (identity composition on the tensor)."""

    def __init__(self, device_pass: bool = False):
        super().__init__()
        self.agents: Dict[str, AgentModuleJax] = {}
        self.connections: Dict[str, Set[str]] = {}
        # device_pass=True routes the result through the (donating, aliased)
        # Pallas pass-through kernel; default is the zero-cost identity.
        self.device_pass = device_pass

    def add_agent(self, name: str, agent: AgentModuleJax) -> None:
        self.agents[name] = agent

    def connect_agents(self, agent1: str, agent2: str) -> None:
        if agent1 not in self.connections:
            self.connections[agent1] = set()
        self.connections[agent1].add(agent2)

    def __call__(self, x: jnp.ndarray) -> jnp.ndarray:
        # Python-level agent-graph traversal (identity on the tensor).
        for agent_name, agent in self.agents.items():
            x = agent(x)
            if agent_name in self.connections:
                for connected_agent in self.connections[agent_name]:
                    if connected_agent in self.agents:
                        x = self.agents[connected_agent](x)
        if self.device_pass:
            # WARNING: x is donated/invalidated by this call.
            return _identity_pass_jit(x, force=True)
        return x


# TODO(synk): AgentModule defines no learnable tensors or tensor ops; the
# forward is provably identity, so there is no matmul/conv/reduction to port.


if __name__ == "__main__":
    key = jax.random.PRNGKey(0)
    # NCHW input, small shape consistent with a conv-style module.
    x = jax.random.normal(key, (2, 4, 16, 16), dtype=jnp.float32)
    x_host = np.asarray(x)  # snapshot before the (donated) device pass

    # Build a small agent network mirroring the PyTorch structure; force the
    # Pallas pass so the kernel is exercised once (default path would skip it).
    net = AgentNetworkJax(device_pass=True)
    a1 = AgentModuleJax()
    a2 = AgentModuleJax()
    a2.specialize("vision")
    a1.assign_task({"kind": "denoise"})   # standard path (identity)
    a2.assign_task({"vision": True})      # expert path (identity)
    net.add_agent("alpha", a1)
    net.add_agent("beta", a2)
    net.connect_agents("alpha", "beta")

    out = net(x)
    out = jax.block_until_ready(out)

    assert out.shape == x_host.shape and out.dtype == jnp.float32
    assert np.allclose(np.asarray(out), x_host), "forward must be identity"

    # Also check the default (zero-launch) path on a fresh tensor.
    y = jax.random.normal(jax.random.PRNGKey(1), (2, 4, 16, 16), dtype=jnp.float32)
    net2 = AgentNetworkJax()  # device_pass=False
    net2.add_agent("alpha", AgentModuleJax())
    out2 = jax.block_until_ready(net2(y))
    assert np.allclose(np.asarray(out2), np.asarray(y))

    print("KERNEL_OK")
</pallas_src>

<mosaic_0001>
module attributes {stable_mosaic.version = 11 : i64} {
  func.func @_copy_kernel(%arg0: i32, %arg1: memref<8x128xf32, #tpu.memory_space<vmem>>, %arg2: memref<8x128xf32, #tpu.memory_space<vmem>>) attributes {dimension_semantics = [#tpu.dimension_semantics<parallel>], iteration_bounds = array<i64: 2>, scalar_prefetch = 0 : i64, scratch_operands = 0 : i64, tpu.core_type = #tpu.core_type<tc>, window_params = [{transform_indices = @transform_0, window_bounds = array<i64: 8, 128>}, {transform_indices = @transform_1, window_bounds = array<i64: 8, 128>}]} {
    %c0 = arith.constant 0 : index
    %c0_0 = arith.constant 0 : index
    %0 = vector.load %arg1[%c0, %c0_0] : memref<8x128xf32, #tpu.memory_space<vmem>>, vector<8x128xf32>
    %c0_1 = arith.constant 0 : index
    %c0_2 = arith.constant 0 : index
    %1 = vector.load %arg2[%c0_1, %c0_2] : memref<8x128xf32, #tpu.memory_space<vmem>>, vector<8x128xf32>
    tpu.vector_store %arg2[%c0_1, %c0_2], %0 {strides = array<i32>} : memref<8x128xf32, #tpu.memory_space<vmem>>, vector<8x128xf32>,
    return
  }
  func.func @transform_0(%arg0: i32) -> (i32, i32) {
    %c0_i32 = arith.constant 0 : i32
    %c0_i32_0 = arith.constant 0 : i32
    return %arg0, %c0_i32 : i32, i32
  }
  func.func @transform_1(%arg0: i32) -> (i32, i32) {
    %c0_i32 = arith.constant 0 : i32
    %c0_i32_0 = arith.constant 0 : i32
    return %arg0, %c0_i32 : i32, i32
  }
}

</mosaic_0001>

<bundles_post_ra>
// kernel: _identity_pass_jit.1
= control target key start
LH: loop header
LB: loop body
LE: loop exit
PB: predicated region body
PF: predicated region fallthrough
CT: control target
= control target key end

     0   :  { %s188_s6 = smov 0   ;;  %s208_s0 = inlined_call_operand.vmem [shape: f32[16,128], index: 0, kind: input, shape index: {}, may-alias: {0,1}]   ;;  %s209_s1 = inlined_call_operand.vmem [shape: f32[16,128], index: 1, kind: output, shape index: {}, may-alias: {0,1}]  }
   0x1 LB: > { %s167_s7 = sadd.s32 4294967295, %s190_s6   ;;  %p171_p0 = scmp.ge.s32.totalorder %s190_s6, 1  ;;  %s190_s6 = sphi %s188_s6, %s11_s6  }
   0x2   : > { %p86_p1 = scmp.lt.s32.totalorder %s190_s6, 3 }
   0x4   : > { %p87_p2 = pnand %p171_p0, %p86_p1 }
   0x5   : > { %p104_p3 = scmp.lt.s32.totalorder (!%p87_p2), %s167_s7, 1 }
   0x6   : > { %90 = sbr.rel (%p87_p2) target bundleno = 16 (0x10), region = 24 }
   0xb   : > { %s211_s7 = smov (!%p104_p3, %s167_s7), 1 }
   0xc   : > { %s172_s8 = sshll.u32 %s211_s7, 3 }
   0xd   : > { %s107_s11 = scalar_lea.vmem %s208_s0, %s172_s8  ;;  %s111_s14 = scalar_lea.vmem %s209_s1, %s172_s8 }
   0xe   : > { %v112_v0 = vld [vmem:[%s107_s11] sm:$0xff] }
   0xf   : > { %113 = vst [vmem:[%s111_s14] sm:$0xff] %v112_v0 }
  0x10 PF: > { %s11_s6 = sadd.s32 1, %s190_s6  }
  0x11   : > { %p8_p4 = scmp.ge.s32.totalorder %s11_s6, 4  }
  0x13   :  { %10 = sbr.rel (!%p8_p4) target bundleno = 1 (0x1), region = 54 }

</bundles_post_ra>
